<compile_context>
chip_gen: v6e
topology: v6e:2x2x1
jax: 0.10.0
libtpu: 0.0.40
codegen_flags: <defaults>
</compile_context>

<pallas_src>
import functools

import jax
import jax.numpy as jnp
from jax.experimental import pallas as pl
from jax.experimental.pallas import tpu as pltpu


def units_in_front(c_in, width, layer_depth):
    """Number of intermediate images (channels) in front of this layer."""
    return c_in + width * layer_depth


def _reflect_index(k, n):
    """Reflect (mirror, no edge repeat -- numpy/torch 'reflect') index k into [0, n)."""
    if k < 0:
        return -k
    if k >= n:
        return 2 * (n - 1) - k
    return k


def _msd_layer_kernel(x_ref, w_ref, b_ref, o_ref, *, d, H, W, c_front, width):
    """One batch element.  Channels on sublanes, flattened spatial on lanes.

    x_ref: (1, c_front, H*W)           layer input, flattened (H, W)
    w_ref: (9, width, c_front)         conv weights, tap-major (ky*3 + kx)
    b_ref: (width, 1)                  bias
    o_ref: (1, c_front + width, H*W)   stitched output [input | relu(conv + b)]
    """
    Wp = W + 2 * d                       # padded row length
    Hp = H + 2 * d                       # padded number of rows
    HWp = H * Wp                         # accumulator lane length (flat-shift layout)

    xv = x_ref[0]                        # (c_front, H*W), read once

    # Fused stitch, part 1: passthrough channels are the input itself
    # (bit-exact copy, lane-dense (c_front, H*W) store, no extra HBM read).
    o_ref[0, 0:c_front, :] = xv

    # Build the reflect-padded image as one flat (c_front, Hp*Wp + 2d) value.
    # Everything is a static lane slice / concatenation (no gathers, no VMEM scratch).
    prows = []
    for i in range(Hp):
        r = _reflect_index(i - d, H)                      # source (unpadded) row
        pieces = []
        for j in range(d):                                # left reflect: cols d..1
            c0 = r * W + (d - j)
            pieces.append(xv[:, c0:c0 + 1])
        pieces.append(xv[:, r * W:(r + 1) * W])           # interior cols 0..W-1
        for j in range(d):                                # right reflect: cols W-2..W-1-d
            c0 = r * W + (W - 2 - j)
            pieces.append(xv[:, c0:c0 + 1])
        prows.append(jnp.concatenate(pieces, axis=1))     # (c_front, Wp)
    # 2d zero lanes absorb the flat-shift overrun of the bottom-row taps; they only
    # ever feed the wrap-around columns u >= W, which are never stored below.
    prows.append(jnp.zeros((c_front, 2 * d), xv.dtype))
    xp = jnp.concatenate(prows, axis=1)                   # (c_front, Hp*Wp + 2d)

    # 9 dilated taps accumulated directly into one f32 accumulator (no im2col scratch,
    # no 9x store+reload through VMEM).
    acc = None
    for ky in range(3):
        for kx in range(3):
            off = (ky * Wp + kx) * d
            tap = xp[:, off:off + HWp]                    # (c_front, H*Wp) flat shift
            contrib = jnp.dot(w_ref[ky * 3 + kx], tap,
                              preferred_element_type=jnp.float32)
            acc = contrib if acc is None else acc + contrib

    acc = jnp.maximum(acc + b_ref[...], 0.0)              # bias + ReLU on f32 accumulator

    # Fused stitch, part 2 + fused "output slice": drop the (Wp - W) wrap columns of
    # every row in-register and emit a single lane-dense (width, H*W) store.
    rows = [acc[:, y * Wp:y * Wp + W] for y in range(H)]
    o_ref[0, c_front:c_front + width, :] = (
        jnp.concatenate(rows, axis=1).astype(o_ref.dtype))


def msd_layer_forward(x_nchw, weight_oihw, bias, dilation):
    """Forward of MSDLayerModule (use_conv_relu=True).

    x_nchw:      (N, in_front, H, W)      float32
    weight_oihw: (width, in_front, 3, 3)  float32 (PyTorch conv layout)
    bias:        (width,)
    returns:     (N, in_front + width, H, W) == [input, relu(dilated_conv(input) + b)]
    """
    N, c_front, H, W = x_nchw.shape
    width = weight_oihw.shape[0]
    d = int(dilation)
    assert 1 <= d < min(H, W), "reflect padding requires dilation < spatial size"
    HW = H * W
    c_out = c_front + width

    # Only free, contiguous reshapes in the wrapper -- the reflect halo, the stitch and
    # the wrap-column drop all live inside the kernel (no extra HBM passes).
    x_flat = x_nchw.reshape(N, c_front, HW).astype(jnp.float32)
    # Weights -> tap-major (9, width, c_front) so the kernel grabs one (width, c_front)
    # tap at a time.  Tiny, done once.
    w_taps = jnp.transpose(weight_oihw, (2, 3, 0, 1)).reshape(9, width, c_front)
    w_taps = w_taps.astype(jnp.float32)
    b_col = bias.reshape(width, 1).astype(jnp.float32)
    # NOTE: the input is kept f32 (not bf16) on purpose: the stitch must pass the input
    # channels through bit-exactly, so those same HBM bytes are read/written as f32
    # regardless and a bf16 copy would not reduce traffic for this memory-bound kernel.
    # In a full MSD stack that keeps activations in bf16 end-to-end, cast here and keep
    # preferred_element_type=jnp.float32 in the kernel.

    kernel = functools.partial(_msd_layer_kernel, d=d, H=H, W=W,
                               c_front=c_front, width=width)

    # Explicit VMEM budget: double-buffered in/out blocks + in-kernel temporaries
    # (padded value + accumulator), with generous headroom.  Tiny at toy sizes, but it
    # documents the footprint and avoids default scoped-VMEM surprises at larger ones.
    tmp_bytes = 4 * c_front * (H + 2 * d) * (W + 2 * d) + 4 * width * H * (W + 2 * d)
    block_bytes = 4 * (2 * c_front * HW + 2 * c_out * HW) + 4 * tmp_bytes
    vmem_limit = int(min(max(2 * block_bytes, 16 * 1024 * 1024), 100 * 1024 * 1024))

    out_flat = pl.pallas_call(
        kernel,
        out_shape=jax.ShapeDtypeStruct((N, c_out, HW), jnp.float32),
        grid_spec=pltpu.PrefetchScalarGridSpec(
            num_scalar_prefetch=0,
            grid=(N,),                       # one image per step; batch across cores
            in_specs=[
                pl.BlockSpec((1, c_front, HW), lambda n: (n, 0, 0)),
                pl.BlockSpec((9, width, c_front), lambda n: (0, 0, 0)),
                pl.BlockSpec((width, 1), lambda n: (0, 0)),
            ],
            out_specs=pl.BlockSpec((1, c_out, HW), lambda n: (n, 0, 0)),
        ),
        compiler_params=pltpu.CompilerParams(
            dimension_semantics=("parallel",),
            vmem_limit_bytes=vmem_limit),
    )(x_flat, w_taps, b_col)
    # TODO(synk): for production image sizes add an H-strip grid axis (overlapping
    # blocks with a 2*d row halo via manual DMA) so blocks fit v7x's 64 MiB VMEM and
    # both TensorCores stay busy at batch 1; the per-row unrolls above then run over
    # the strip height only.
    # TODO(synk): in a stacked MSDModule, keep one shared (N, c_total, H, W) L buffer
    # aliased through every layer (input_output_aliases) so each layer writes only its
    # `width` new channels instead of re-stitching all previous channels (O(depth^2)
    # write traffic today at the network level).
    # TODO(synk): for very small images, fold a small batch tile into each grid step to
    # amortize the ~0.35us per-step overhead.

    return out_flat.reshape(N, c_out, H, W)   # free contiguous reshape


if __name__ == "__main__":
    # Module hyper-parameters (small, consistent with the module's __init__).
    c_in, width, layer_depth = 4, 2, 2
    in_front = units_in_front(c_in, width, layer_depth)        # 4 + 2*2 = 8
    N, H, W = 2, 16, 16

    key = jax.random.PRNGKey(0)
    k_x, k_w, k_b = jax.random.split(key, 3)

    # Deterministic parameter init (MSD-style scale; small random bias).
    w_scale = jnp.sqrt(2.0 / (9.0 * in_front))
    weight = jax.random.normal(k_w, (width, in_front, 3, 3), jnp.float32) * w_scale
    bias = jax.random.normal(k_b, (width,), jnp.float32) * 0.01
    x = jax.random.normal(k_x, (N, in_front, H, W), jnp.float32)

    for dilation in (1, 2, 3):
        fwd = jax.jit(functools.partial(msd_layer_forward, dilation=dilation))
        out = jax.block_until_ready(fwd(x, weight, bias))
        assert out.shape == (N, in_front + width, H, W), out.shape

        # Pure-JAX reference: reflect pad -> dilated VALID conv -> bias -> relu -> stitch.
        x_pad_ref = jnp.pad(
            x, ((0, 0), (0, 0), (dilation, dilation), (dilation, dilation)),
            mode="reflect")
        conv = jax.lax.conv_general_dilated(
            x_pad_ref, weight, window_strides=(1, 1), padding="VALID",
            rhs_dilation=(dilation, dilation),
            dimension_numbers=("NCHW", "OIHW", "NCHW"))
        ref = jnp.concatenate(
            [x, jnp.maximum(conv + bias.reshape(1, width, 1, 1), 0.0)], axis=1)
        assert jnp.allclose(out, ref, rtol=1e-4, atol=1e-4), (
            f"mismatch vs reference at dilation={dilation}")

    print("KERNEL_OK")
</pallas_src>

<mosaic_0001>
module attributes {stable_mosaic.version = 11 : i64} {
  func.func @_msd_layer_kernel(%arg0: i32, %arg1: memref<1x8x256xf32, #tpu.memory_space<vmem>>, %arg2: memref<9x2x8xf32, #tpu.memory_space<vmem>>, %arg3: memref<2x1xf32, #tpu.memory_space<vmem>>, %arg4: memref<1x10x256xf32, #tpu.memory_space<vmem>>) attributes {dimension_semantics = [#tpu.dimension_semantics<parallel>], iteration_bounds = array<i64: 2>, scalar_prefetch = 0 : i64, scratch_operands = 0 : i64, tpu.core_type = #tpu.core_type<tc>, window_params = [{transform_indices = @transform_0, window_bounds = array<i64: 1, 8, 256>}, {pipeline_mode = #tpu.pipeline_mode<synchronous>, transform_indices = @transform_1, window_bounds = array<i64: 9, 2, 8>}, {pipeline_mode = #tpu.pipeline_mode<synchronous>, transform_indices = @transform_2, window_bounds = array<i64: 2, 1>}, {transform_indices = @transform_3, window_bounds = array<i64: 1, 10, 256>}]} {
    %c0 = arith.constant 0 : index
    %c0_0 = arith.constant 0 : index
    %c0_1 = arith.constant 0 : index
    %0 = vector.load %arg1[%c0, %c0_0, %c0_1] : memref<1x8x256xf32, #tpu.memory_space<vmem>>, vector<1x8x256xf32>
    %1 = vector.shape_cast %0 : vector<1x8x256xf32> to vector<8x256xf32>
    %c0_2 = arith.constant 0 : index
    %c0_3 = arith.constant 0 : index
    %c0_4 = arith.constant 0 : index
    %2 = vector.load %arg4[%c0_2, %c0_3, %c0_4] : memref<1x10x256xf32, #tpu.memory_space<vmem>>, vector<1x8x256xf32>
    %3 = vector.shape_cast %2 : vector<1x8x256xf32> to vector<8x256xf32>
    %4 = vector.shape_cast %1 : vector<8x256xf32> to vector<1x8x256xf32>
    tpu.vector_store %arg4[%c0_2, %c0_3, %c0_4], %4 {strides = array<i32>} : memref<1x10x256xf32, #tpu.memory_space<vmem>>, vector<1x8x256xf32>,
    %5 = vector.extract_strided_slice %1 {offsets = [0, 17], sizes = [8, 1], strides = [1, 1]} : vector<8x256xf32> to vector<8x1xf32>
    %6 = vector.extract_strided_slice %1 {offsets = [0, 16], sizes = [8, 16], strides = [1, 1]} : vector<8x256xf32> to vector<8x16xf32>
    %7 = vector.extract_strided_slice %1 {offsets = [0, 30], sizes = [8, 1], strides = [1, 1]} : vector<8x256xf32> to vector<8x1xf32>
    %8 = tpu.concatenate %5, %6, %7 in 1 : vector<8x1xf32>, vector<8x16xf32>, vector<8x1xf32> -> vector<8x18xf32>
    %9 = vector.extract_strided_slice %1 {offsets = [0, 1], sizes = [8, 1], strides = [1, 1]} : vector<8x256xf32> to vector<8x1xf32>
    %10 = vector.extract_strided_slice %1 {offsets = [0, 0], sizes = [8, 16], strides = [1, 1]} : vector<8x256xf32> to vector<8x16xf32>
    %11 = vector.extract_strided_slice %1 {offsets = [0, 14], sizes = [8, 1], strides = [1, 1]} : vector<8x256xf32> to vector<8x1xf32>
    %12 = tpu.concatenate %9, %10, %11 in 1 : vector<8x1xf32>, vector<8x16xf32>, vector<8x1xf32> -> vector<8x18xf32>
    %13 = vector.extract_strided_slice %1 {offsets = [0, 17], sizes = [8, 1], strides = [1, 1]} : vector<8x256xf32> to vector<8x1xf32>
    %14 = vector.extract_strided_slice %1 {offsets = [0, 16], sizes = [8, 16], strides = [1, 1]} : vector<8x256xf32> to vector<8x16xf32>
    %15 = vector.extract_strided_slice %1 {offsets = [0, 30], sizes = [8, 1], strides = [1, 1]} : vector<8x256xf32> to vector<8x1xf32>
    %16 = tpu.concatenate %13, %14, %15 in 1 : vector<8x1xf32>, vector<8x16xf32>, vector<8x1xf32> -> vector<8x18xf32>
    %17 = vector.extract_strided_slice %1 {offsets = [0, 33], sizes = [8, 1], strides = [1, 1]} : vector<8x256xf32> to vector<8x1xf32>
    %18 = vector.extract_strided_slice %1 {offsets = [0, 32], sizes = [8, 16], strides = [1, 1]} : vector<8x256xf32> to vector<8x16xf32>
    %19 = vector.extract_strided_slice %1 {offsets = [0, 46], sizes = [8, 1], strides = [1, 1]} : vector<8x256xf32> to vector<8x1xf32>
    %20 = tpu.concatenate %17, %18, %19 in 1 : vector<8x1xf32>, vector<8x16xf32>, vector<8x1xf32> -> vector<8x18xf32>
    %21 = vector.extract_strided_slice %1 {offsets = [0, 49], sizes = [8, 1], strides = [1, 1]} : vector<8x256xf32> to vector<8x1xf32>
    %22 = vector.extract_strided_slice %1 {offsets = [0, 48], sizes = [8, 16], strides = [1, 1]} : vector<8x256xf32> to vector<8x16xf32>
    %23 = vector.extract_strided_slice %1 {offsets = [0, 62], sizes = [8, 1], strides = [1, 1]} : vector<8x256xf32> to vector<8x1xf32>
    %24 = tpu.concatenate %21, %22, %23 in 1 : vector<8x1xf32>, vector<8x16xf32>, vector<8x1xf32> -> vector<8x18xf32>
    %25 = vector.extract_strided_slice %1 {offsets = [0, 65], sizes = [8, 1], strides = [1, 1]} : vector<8x256xf32> to vector<8x1xf32>
    %26 = vector.extract_strided_slice %1 {offsets = [0, 64], sizes = [8, 16], strides = [1, 1]} : vector<8x256xf32> to vector<8x16xf32>
    %27 = vector.extract_strided_slice %1 {offsets = [0, 78], sizes = [8, 1], strides = [1, 1]} : vector<8x256xf32> to vector<8x1xf32>
    %28 = tpu.concatenate %25, %26, %27 in 1 : vector<8x1xf32>, vector<8x16xf32>, vector<8x1xf32> -> vector<8x18xf32>
    %29 = vector.extract_strided_slice %1 {offsets = [0, 81], sizes = [8, 1], strides = [1, 1]} : vector<8x256xf32> to vector<8x1xf32>
    %30 = vector.extract_strided_slice %1 {offsets = [0, 80], sizes = [8, 16], strides = [1, 1]} : vector<8x256xf32> to vector<8x16xf32>
    %31 = vector.extract_strided_slice %1 {offsets = [0, 94], sizes = [8, 1], strides = [1, 1]} : vector<8x256xf32> to vector<8x1xf32>
    %32 = tpu.concatenate %29, %30, %31 in 1 : vector<8x1xf32>, vector<8x16xf32>, vector<8x1xf32> -> vector<8x18xf32>
    %33 = vector.extract_strided_slice %1 {offsets = [0, 97], sizes = [8, 1], strides = [1, 1]} : vector<8x256xf32> to vector<8x1xf32>
    %34 = vector.extract_strided_slice %1 {offsets = [0, 96], sizes = [8, 16], strides = [1, 1]} : vector<8x256xf32> to vector<8x16xf32>
    %35 = vector.extract_strided_slice %1 {offsets = [0, 110], sizes = [8, 1], strides = [1, 1]} : vector<8x256xf32> to vector<8x1xf32>
    %36 = tpu.concatenate %33, %34, %35 in 1 : vector<8x1xf32>, vector<8x16xf32>, vector<8x1xf32> -> vector<8x18xf32>
    %37 = vector.extract_strided_slice %1 {offsets = [0, 113], sizes = [8, 1], strides = [1, 1]} : vector<8x256xf32> to vector<8x1xf32>
    %38 = vector.extract_strided_slice %1 {offsets = [0, 112], sizes = [8, 16], strides = [1, 1]} : vector<8x256xf32> to vector<8x16xf32>
    %39 = vector.extract_strided_slice %1 {offsets = [0, 126], sizes = [8, 1], strides = [1, 1]} : vector<8x256xf32> to vector<8x1xf32>
    %40 = tpu.concatenate %37, %38, %39 in 1 : vector<8x1xf32>, vector<8x16xf32>, vector<8x1xf32> -> vector<8x18xf32>
    %41 = vector.extract_strided_slice %1 {offsets = [0, 129], sizes = [8, 1], strides = [1, 1]} : vector<8x256xf32> to vector<8x1xf32>
    %42 = vector.extract_strided_slice %1 {offsets = [0, 128], sizes = [8, 16], strides = [1, 1]} : vector<8x256xf32> to vector<8x16xf32>
    %43 = vector.extract_strided_slice %1 {offsets = [0, 142], sizes = [8, 1], strides = [1, 1]} : vector<8x256xf32> to vector<8x1xf32>
    %44 = tpu.concatenate %41, %42, %43 in 1 : vector<8x1xf32>, vector<8x16xf32>, vector<8x1xf32> -> vector<8x18xf32>
    %45 = vector.extract_strided_slice %1 {offsets = [0, 145], sizes = [8, 1], strides = [1, 1]} : vector<8x256xf32> to vector<8x1xf32>
    %46 = vector.extract_strided_slice %1 {offsets = [0, 144], sizes = [8, 16], strides = [1, 1]} : vector<8x256xf32> to vector<8x16xf32>
    %47 = vector.extract_strided_slice %1 {offsets = [0, 158], sizes = [8, 1], strides = [1, 1]} : vector<8x256xf32> to vector<8x1xf32>
    %48 = tpu.concatenate %45, %46, %47 in 1 : vector<8x1xf32>, vector<8x16xf32>, vector<8x1xf32> -> vector<8x18xf32>
    %49 = vector.extract_strided_slice %1 {offsets = [0, 161], sizes = [8, 1], strides = [1, 1]} : vector<8x256xf32> to vector<8x1xf32>
    %50 = vector.extract_strided_slice %1 {offsets = [0, 160], sizes = [8, 16], strides = [1, 1]} : vector<8x256xf32> to vector<8x16xf32>
    %51 = vector.extract_strided_slice %1 {offsets = [0, 174], sizes = [8, 1], strides = [1, 1]} : vector<8x256xf32> to vector<8x1xf32>
    %52 = tpu.concatenate %49, %50, %51 in 1 : vector<8x1xf32>, vector<8x16xf32>, vector<8x1xf32> -> vector<8x18xf32>
    %53 = vector.extract_strided_slice %1 {offsets = [0, 177], sizes = [8, 1], strides = [1, 1]} : vector<8x256xf32> to vector<8x1xf32>
    %54 = vector.extract_strided_slice %1 {offsets = [0, 176], sizes = [8, 16], strides = [1, 1]} : vector<8x256xf32> to vector<8x16xf32>
    %55 = vector.extract_strided_slice %1 {offsets = [0, 190], sizes = [8, 1], strides = [1, 1]} : vector<8x256xf32> to vector<8x1xf32>
    %56 = tpu.concatenate %53, %54, %55 in 1 : vector<8x1xf32>, vector<8x16xf32>, vector<8x1xf32> -> vector<8x18xf32>
    %57 = vector.extract_strided_slice %1 {offsets = [0, 193], sizes = [8, 1], strides = [1, 1]} : vector<8x256xf32> to vector<8x1xf32>
    %58 = vector.extract_strided_slice %1 {offsets = [0, 192], sizes = [8, 16], strides = [1, 1]} : vector<8x256xf32> to vector<8x16xf32>
    %59 = vector.extract_strided_slice %1 {offsets = [0, 206], sizes = [8, 1], strides = [1, 1]} : vector<8x256xf32> to vector<8x1xf32>
    %60 = tpu.concatenate %57, %58, %59 in 1 : vector<8x1xf32>, vector<8x16xf32>, vector<8x1xf32> -> vector<8x18xf32>
    %61 = vector.extract_strided_slice %1 {offsets = [0, 209], sizes = [8, 1], strides = [1, 1]} : vector<8x256xf32> to vector<8x1xf32>
    %62 = vector.extract_strided_slice %1 {offsets = [0, 208], sizes = [8, 16], strides = [1, 1]} : vector<8x256xf32> to vector<8x16xf32>
    %63 = vector.extract_strided_slice %1 {offsets = [0, 222], sizes = [8, 1], strides = [1, 1]} : vector<8x256xf32> to vector<8x1xf32>
    %64 = tpu.concatenate %61, %62, %63 in 1 : vector<8x1xf32>, vector<8x16xf32>, vector<8x1xf32> -> vector<8x18xf32>
    %65 = vector.extract_strided_slice %1 {offsets = [0, 225], sizes = [8, 1], strides = [1, 1]} : vector<8x256xf32> to vector<8x1xf32>
    %66 = vector.extract_strided_slice %1 {offsets = [0, 224], sizes = [8, 16], strides = [1, 1]} : vector<8x256xf32> to vector<8x16xf32>
    %67 = vector.extract_strided_slice %1 {offsets = [0, 238], sizes = [8, 1], strides = [1, 1]} : vector<8x256xf32> to vector<8x1xf32>
    %68 = tpu.concatenate %65, %66, %67 in 1 : vector<8x1xf32>, vector<8x16xf32>, vector<8x1xf32> -> vector<8x18xf32>
    %69 = vector.extract_strided_slice %1 {offsets = [0, 241], sizes = [8, 1], strides = [1, 1]} : vector<8x256xf32> to vector<8x1xf32>
    %70 = vector.extract_strided_slice %1 {offsets = [0, 240], sizes = [8, 16], strides = [1, 1]} : vector<8x256xf32> to vector<8x16xf32>
    %71 = vector.extract_strided_slice %1 {offsets = [0, 254], sizes = [8, 1], strides = [1, 1]} : vector<8x256xf32> to vector<8x1xf32>
    %72 = tpu.concatenate %69, %70, %71 in 1 : vector<8x1xf32>, vector<8x16xf32>, vector<8x1xf32> -> vector<8x18xf32>
    %73 = vector.extract_strided_slice %1 {offsets = [0, 225], sizes = [8, 1], strides = [1, 1]} : vector<8x256xf32> to vector<8x1xf32>
    %74 = vector.extract_strided_slice %1 {offsets = [0, 224], sizes = [8, 16], strides = [1, 1]} : vector<8x256xf32> to vector<8x16xf32>
    %75 = vector.extract_strided_slice %1 {offsets = [0, 238], sizes = [8, 1], strides = [1, 1]} : vector<8x256xf32> to vector<8x1xf32>
    %76 = tpu.concatenate %73, %74, %75 in 1 : vector<8x1xf32>, vector<8x16xf32>, vector<8x1xf32> -> vector<8x18xf32>
    %cst = arith.constant 0.000000e+00 : f32
    %77 = vector.broadcast %cst : f32 to vector<8x2xf32>
    %78 = tpu.concatenate %8, %12, %16, %20, %24, %28, %32, %36, %40, %44, %48, %52, %56, %60, %64, %68 in 1 : vector<8x18xf32>, vector<8x18xf32>, vector<8x18xf32>, vector<8x18xf32>, vector<8x18xf32>, vector<8x18xf32>, vector<8x18xf32>, vector<8x18xf32>, vector<8x18xf32>, vector<8x18xf32>, vector<8x18xf32>, vector<8x18xf32>, vector<8x18xf32>, vector<8x18xf32>, vector<8x18xf32>, vector<8x18xf32> -> vector<8x288xf32>
    %79 = tpu.concatenate %72, %76, %77 in 1 : vector<8x18xf32>, vector<8x18xf32>, vector<8x2xf32> -> vector<8x38xf32>
    %80 = tpu.concatenate %78, %79 in 1 : vector<8x288xf32>, vector<8x38xf32> -> vector<8x326xf32>
    %81 = vector.extract_strided_slice %80 {offsets = [0, 0], sizes = [8, 288], strides = [1, 1]} : vector<8x326xf32> to vector<8x288xf32>
    %c0_5 = arith.constant 0 : index
    %c0_6 = arith.constant 0 : index
    %c0_7 = arith.constant 0 : index
    %82 = vector.load %arg2[%c0_5, %c0_6, %c0_7] : memref<9x2x8xf32, #tpu.memory_space<vmem>>, vector<1x2x8xf32>
    %83 = vector.shape_cast %82 : vector<1x2x8xf32> to vector<2x8xf32>
    %cst_8 = arith.constant dense<0.000000e+00> : vector<2x288xf32>
    %84 = tpu.matmul %83, %81, %cst_8 {dimension_numbers = #tpu.dot_dimension_numbers<[1], [0], [0], [1], [0, 0, 1, 1], [], []>} : vector<2x8xf32>, vector<8x288xf32>, vector<2x288xf32> -> vector<2x288xf32>
    %85 = vector.extract_strided_slice %80 {offsets = [0, 1], sizes = [8, 288], strides = [1, 1]} : vector<8x326xf32> to vector<8x288xf32>
    %c1 = arith.constant 1 : index
    %c0_9 = arith.constant 0 : index
    %c0_10 = arith.constant 0 : index
    %86 = vector.load %arg2[%c1, %c0_9, %c0_10] : memref<9x2x8xf32, #tpu.memory_space<vmem>>, vector<1x2x8xf32>
    %87 = vector.shape_cast %86 : vector<1x2x8xf32> to vector<2x8xf32>
    %cst_11 = arith.constant dense<0.000000e+00> : vector<2x288xf32>
    %88 = tpu.matmul %87, %85, %cst_11 {dimension_numbers = #tpu.dot_dimension_numbers<[1], [0], [0], [1], [0, 0, 1, 1], [], []>} : vector<2x8xf32>, vector<8x288xf32>, vector<2x288xf32> -> vector<2x288xf32>
    %89 = arith.addf %84, %88 : vector<2x288xf32>
    %90 = vector.extract_strided_slice %80 {offsets = [0, 2], sizes = [8, 288], strides = [1, 1]} : vector<8x326xf32> to vector<8x288xf32>
    %c2 = arith.constant 2 : index
    %c0_12 = arith.constant 0 : index
    %c0_13 = arith.constant 0 : index
    %91 = vector.load %arg2[%c2, %c0_12, %c0_13] : memref<9x2x8xf32, #tpu.memory_space<vmem>>, vector<1x2x8xf32>
    %92 = vector.shape_cast %91 : vector<1x2x8xf32> to vector<2x8xf32>
    %cst_14 = arith.constant dense<0.000000e+00> : vector<2x288xf32>
    %93 = tpu.matmul %92, %90, %cst_14 {dimension_numbers = #tpu.dot_dimension_numbers<[1], [0], [0], [1], [0, 0, 1, 1], [], []>} : vector<2x8xf32>, vector<8x288xf32>, vector<2x288xf32> -> vector<2x288xf32>
    %94 = arith.addf %89, %93 : vector<2x288xf32>
    %95 = vector.extract_strided_slice %80 {offsets = [0, 18], sizes = [8, 288], strides = [1, 1]} : vector<8x326xf32> to vector<8x288xf32>
    %c3 = arith.constant 3 : index
    %c0_15 = arith.constant 0 : index
    %c0_16 = arith.constant 0 : index
    %96 = vector.load %arg2[%c3, %c0_15, %c0_16] : memref<9x2x8xf32, #tpu.memory_space<vmem>>, vector<1x2x8xf32>
    %97 = vector.shape_cast %96 : vector<1x2x8xf32> to vector<2x8xf32>
    %cst_17 = arith.constant dense<0.000000e+00> : vector<2x288xf32>
    %98 = tpu.matmul %97, %95, %cst_17 {dimension_numbers = #tpu.dot_dimension_numbers<[1], [0], [0], [1], [0, 0, 1, 1], [], []>} : vector<2x8xf32>, vector<8x288xf32>, vector<2x288xf32> -> vector<2x288xf32>
    %99 = arith.addf %94, %98 : vector<2x288xf32>
    %100 = vector.extract_strided_slice %80 {offsets = [0, 19], sizes = [8, 288], strides = [1, 1]} : vector<8x326xf32> to vector<8x288xf32>
    %c4 = arith.constant 4 : index
    %c0_18 = arith.constant 0 : index
    %c0_19 = arith.constant 0 : index
    %101 = vector.load %arg2[%c4, %c0_18, %c0_19] : memref<9x2x8xf32, #tpu.memory_space<vmem>>, vector<1x2x8xf32>
    %102 = vector.shape_cast %101 : vector<1x2x8xf32> to vector<2x8xf32>
    %cst_20 = arith.constant dense<0.000000e+00> : vector<2x288xf32>
    %103 = tpu.matmul %102, %100, %cst_20 {dimension_numbers = #tpu.dot_dimension_numbers<[1], [0], [0], [1], [0, 0, 1, 1], [], []>} : vector<2x8xf32>, vector<8x288xf32>, vector<2x288xf32> -> vector<2x288xf32>
    %104 = arith.addf %99, %103 : vector<2x288xf32>
    %105 = vector.extract_strided_slice %80 {offsets = [0, 20], sizes = [8, 288], strides = [1, 1]} : vector<8x326xf32> to vector<8x288xf32>
    %c5 = arith.constant 5 : index
    %c0_21 = arith.constant 0 : index
    %c0_22 = arith.constant 0 : index
    %106 = vector.load %arg2[%c5, %c0_21, %c0_22] : memref<9x2x8xf32, #tpu.memory_space<vmem>>, vector<1x2x8xf32>
    %107 = vector.shape_cast %106 : vector<1x2x8xf32> to vector<2x8xf32>
    %cst_23 = arith.constant dense<0.000000e+00> : vector<2x288xf32>
    %108 = tpu.matmul %107, %105, %cst_23 {dimension_numbers = #tpu.dot_dimension_numbers<[1], [0], [0], [1], [0, 0, 1, 1], [], []>} : vector<2x8xf32>, vector<8x288xf32>, vector<2x288xf32> -> vector<2x288xf32>
    %109 = arith.addf %104, %108 : vector<2x288xf32>
    %110 = vector.extract_strided_slice %80 {offsets = [0, 36], sizes = [8, 288], strides = [1, 1]} : vector<8x326xf32> to vector<8x288xf32>
    %c6 = arith.constant 6 : index
    %c0_24 = arith.constant 0 : index
    %c0_25 = arith.constant 0 : index
    %111 = vector.load %arg2[%c6, %c0_24, %c0_25] : memref<9x2x8xf32, #tpu.memory_space<vmem>>, vector<1x2x8xf32>
    %112 = vector.shape_cast %111 : vector<1x2x8xf32> to vector<2x8xf32>
    %cst_26 = arith.constant dense<0.000000e+00> : vector<2x288xf32>
    %113 = tpu.matmul %112, %110, %cst_26 {dimension_numbers = #tpu.dot_dimension_numbers<[1], [0], [0], [1], [0, 0, 1, 1], [], []>} : vector<2x8xf32>, vector<8x288xf32>, vector<2x288xf32> -> vector<2x288xf32>
    %114 = arith.addf %109, %113 : vector<2x288xf32>
    %115 = vector.extract_strided_slice %80 {offsets = [0, 37], sizes = [8, 288], strides = [1, 1]} : vector<8x326xf32> to vector<8x288xf32>
    %c7 = arith.constant 7 : index
    %c0_27 = arith.constant 0 : index
    %c0_28 = arith.constant 0 : index
    %116 = vector.load %arg2[%c7, %c0_27, %c0_28] : memref<9x2x8xf32, #tpu.memory_space<vmem>>, vector<1x2x8xf32>
    %117 = vector.shape_cast %116 : vector<1x2x8xf32> to vector<2x8xf32>
    %cst_29 = arith.constant dense<0.000000e+00> : vector<2x288xf32>
    %118 = tpu.matmul %117, %115, %cst_29 {dimension_numbers = #tpu.dot_dimension_numbers<[1], [0], [0], [1], [0, 0, 1, 1], [], []>} : vector<2x8xf32>, vector<8x288xf32>, vector<2x288xf32> -> vector<2x288xf32>
    %119 = arith.addf %114, %118 : vector<2x288xf32>
    %120 = vector.extract_strided_slice %80 {offsets = [0, 38], sizes = [8, 288], strides = [1, 1]} : vector<8x326xf32> to vector<8x288xf32>
    %c8 = arith.constant 8 : index
    %c0_30 = arith.constant 0 : index
    %c0_31 = arith.constant 0 : index
    %121 = vector.load %arg2[%c8, %c0_30, %c0_31] : memref<9x2x8xf32, #tpu.memory_space<vmem>>, vector<1x2x8xf32>
    %122 = vector.shape_cast %121 : vector<1x2x8xf32> to vector<2x8xf32>
    %cst_32 = arith.constant dense<0.000000e+00> : vector<2x288xf32>
    %123 = tpu.matmul %122, %120, %cst_32 {dimension_numbers = #tpu.dot_dimension_numbers<[1], [0], [0], [1], [0, 0, 1, 1], [], []>} : vector<2x8xf32>, vector<8x288xf32>, vector<2x288xf32> -> vector<2x288xf32>
    %124 = arith.addf %119, %123 : vector<2x288xf32>
    %c0_33 = arith.constant 0 : index
    %c0_34 = arith.constant 0 : index
    %125 = vector.load %arg3[%c0_33, %c0_34] : memref<2x1xf32, #tpu.memory_space<vmem>>, vector<2x1xf32>
    %126 = vector.broadcast %125 : vector<2x1xf32> to vector<2x288xf32>
    %127 = arith.addf %124, %126 : vector<2x288xf32>
    %cst_35 = arith.constant 0.000000e+00 : f32
    %128 = vector.broadcast %cst_35 : f32 to vector<2x288xf32>
    %129 = arith.maximumf %127, %128 : vector<2x288xf32>
    %130 = vector.extract_strided_slice %129 {offsets = [0, 0], sizes = [2, 16], strides = [1, 1]} : vector<2x288xf32> to vector<2x16xf32>
    %131 = vector.extract_strided_slice %129 {offsets = [0, 18], sizes = [2, 16], strides = [1, 1]} : vector<2x288xf32> to vector<2x16xf32>
    %132 = vector.extract_strided_slice %129 {offsets = [0, 36], sizes = [2, 16], strides = [1, 1]} : vector<2x288xf32> to vector<2x16xf32>
    %133 = vector.extract_strided_slice %129 {offsets = [0, 54], sizes = [2, 16], strides = [1, 1]} : vector<2x288xf32> to vector<2x16xf32>
    %134 = vector.extract_strided_slice %129 {offsets = [0, 72], sizes = [2, 16], strides = [1, 1]} : vector<2x288xf32> to vector<2x16xf32>
    %135 = vector.extract_strided_slice %129 {offsets = [0, 90], sizes = [2, 16], strides = [1, 1]} : vector<2x288xf32> to vector<2x16xf32>
    %136 = vector.extract_strided_slice %129 {offsets = [0, 108], sizes = [2, 16], strides = [1, 1]} : vector<2x288xf32> to vector<2x16xf32>
    %137 = vector.extract_strided_slice %129 {offsets = [0, 126], sizes = [2, 16], strides = [1, 1]} : vector<2x288xf32> to vector<2x16xf32>
    %138 = vector.extract_strided_slice %129 {offsets = [0, 144], sizes = [2, 16], strides = [1, 1]} : vector<2x288xf32> to vector<2x16xf32>
    %139 = vector.extract_strided_slice %129 {offsets = [0, 162], sizes = [2, 16], strides = [1, 1]} : vector<2x288xf32> to vector<2x16xf32>
    %140 = vector.extract_strided_slice %129 {offsets = [0, 180], sizes = [2, 16], strides = [1, 1]} : vector<2x288xf32> to vector<2x16xf32>
    %141 = vector.extract_strided_slice %129 {offsets = [0, 198], sizes = [2, 16], strides = [1, 1]} : vector<2x288xf32> to vector<2x16xf32>
    %142 = vector.extract_strided_slice %129 {offsets = [0, 216], sizes = [2, 16], strides = [1, 1]} : vector<2x288xf32> to vector<2x16xf32>
    %143 = vector.extract_strided_slice %129 {offsets = [0, 234], sizes = [2, 16], strides = [1, 1]} : vector<2x288xf32> to vector<2x16xf32>
    %144 = vector.extract_strided_slice %129 {offsets = [0, 252], sizes = [2, 16], strides = [1, 1]} : vector<2x288xf32> to vector<2x16xf32>
    %145 = vector.extract_strided_slice %129 {offsets = [0, 270], sizes = [2, 16], strides = [1, 1]} : vector<2x288xf32> to vector<2x16xf32>
    %146 = tpu.concatenate %130, %131, %132, %133, %134, %135, %136, %137, %138, %139, %140, %141, %142, %143, %144, %145 in 1 : vector<2x16xf32>, vector<2x16xf32>, vector<2x16xf32>, vector<2x16xf32>, vector<2x16xf32>, vector<2x16xf32>, vector<2x16xf32>, vector<2x16xf32>, vector<2x16xf32>, vector<2x16xf32>, vector<2x16xf32>, vector<2x16xf32>, vector<2x16xf32>, vector<2x16xf32>, vector<2x16xf32>, vector<2x16xf32> -> vector<2x256xf32>
    %c0_36 = arith.constant 0 : index
    %c8_37 = arith.constant 8 : index
    %c0_38 = arith.constant 0 : index
    %147 = vector.load %arg4[%c0_36, %c8_37, %c0_38] : memref<1x10x256xf32, #tpu.memory_space<vmem>>, vector<1x2x256xf32>
    %148 = vector.shape_cast %147 : vector<1x2x256xf32> to vector<2x256xf32>
    %149 = vector.shape_cast %146 : vector<2x256xf32> to vector<1x2x256xf32>
    tpu.vector_store %arg4[%c0_36, %c8_37, %c0_38], %149 {strides = array<i32>} : memref<1x10x256xf32, #tpu.memory_space<vmem>>, vector<1x2x256xf32>,
    return
  }
  func.func @transform_0(%arg0: i32) -> (i32, i32, i32) {
    %c0_i32 = arith.constant 0 : i32
    %c0_i32_0 = arith.constant 0 : i32
    %c0_i32_1 = arith.constant 0 : i32
    return %arg0, %c0_i32, %c0_i32_0 : i32, i32, i32
  }
  func.func @transform_1(%arg0: i32) -> (i32, i32, i32) {
    %c0_i32 = arith.constant 0 : i32
    %c0_i32_0 = arith.constant 0 : i32
    %c0_i32_1 = arith.constant 0 : i32
    %c0_i32_2 = arith.constant 0 : i32
    return %c0_i32, %c0_i32_0, %c0_i32_1 : i32, i32, i32
  }
  func.func @transform_2(%arg0: i32) -> (i32, i32) {
    %c0_i32 = arith.constant 0 : i32
    %c0_i32_0 = arith.constant 0 : i32
    %c0_i32_1 = arith.constant 0 : i32
    return %c0_i32, %c0_i32_0 : i32, i32
  }
  func.func @transform_3(%arg0: i32) -> (i32, i32, i32) {
    %c0_i32 = arith.constant 0 : i32
    %c0_i32_0 = arith.constant 0 : i32
    %c0_i32_1 = arith.constant 0 : i32
    return %arg0, %c0_i32, %c0_i32_0 : i32, i32, i32
  }
}

</mosaic_0001>

<bundles_post_ra>
// kernel: msd_layer_forward.1
= control target key start
LH: loop header
LB: loop body
LE: loop exit
PB: predicated region body
PF: predicated region fallthrough
CT: control target
= control target key end

     0   :  { %s2285_s12 = smov 0   ;;  %s2564_s0 = inlined_call_operand.vmem [shape: f32[2,8,256], index: 0, kind: input, shape index: {}]   ;;  %s2565_s1 = inlined_call_operand.vmem [shape: f32[9,2,8], index: 1, kind: input, shape index: {}]   ;;  %s2566_s2 = inlined_call_operand.vmem [shape: f32[2,1], index: 2, kind: input, shape index: {}]   ;;  %s2567_s3 = inlined_call_operand.vmem [shape: f32[2,10,256], index: 3, kind: output, shape index: {}]  }
   0x1 LB: > { %s2031_s13 = sadd.s32 4294967295, %s2206_s12   ;;  %p2035_p0 = scmp.ge.s32.totalorder %s2206_s12, 1  ;;  %s2206_s12 = sphi %s2285_s12, %s13_s12  }
   0x2   : > { %p137_p1 = scmp.lt.s32.totalorder %s2206_s12, 3 }
   0x4   : > { %p138_p2 = pnand %p2035_p0, %p137_p1 }
   0x5   : > { %p161_p3 = scmp.lt.s32.totalorder (!%p138_p2), %s2031_s13, 1  ;;  %s2208_s18 = smov (!%p138_p2), 35  }
   0x6   : > { %141 = sbr.rel (%p138_p2) target bundleno = 867 (0x363), region = 32  ;;  %s2209_s19 = smov (!%p138_p2), 31  }
   0x7   : > { %s2210_s20 = smov (!%p138_p2), 33   ;;  %s2211_s21 = smov (!%p138_p2), 15  }
   0x8   : > { %s2212_s22 = smov (!%p138_p2), 17   ;;  %s2213_s23 = smov (!%p138_p2), 127  }
   0x9   : > { %s2214_s24 = smov (!%p138_p2), 1   ;;  %s2215_s25 = smov (!%p138_p2), 19  }
   0xa   : > { %s2216_s26 = smov (!%p138_p2), 111   ;;  %s2217_s27 = smov (!%p138_p2), 113  }
   0xb   : > { %s2569_s13 = smov (!%p161_p3, %s2031_s13), 1  ;;  %s2218_s28 = smov 3   ;;  %vm185_vm0 = vcmask 7168   ;;  %vm187_vm1 = vcmask 138240   ;;  %vm415_vm2 = vcmask 146432   ;;  %vm417_vm3 = vcmask 293888  }
   0xc   : > { %s2068_s14 = sshll.u32 %s2569_s13, 4  ;;  %s2219_s29 = smov 115   ;;  %vm429_vm4 = vcmask 130048   ;;  %vm431_vm5 = vcmask 277504   ;;  %vm433_vm6 = vcmask 424960   ;;  %vm435_vm7 = vcmask 572416  }
   0xd   : > { %s165_s17 = scalar_lea.vmem %s2564_s0, %s2068_s14  ;;  %s2220_s30 = smov 95   ;;  %vm437_vm8 = vcmask 719872   ;;  %vm439_vm9 = vcmask 867328   ;;  %vm441_vm10 = vcmask 1014784   ;;  %vm419_vm11 = vcmask 441344  }
   0xe   : > { %v2299_v0 = vld [vmem:[%s165_s17 + $0x8] sm:$0xff]  ;;  %v2303_v1 = vld [vmem:[%s165_s17] sm:$0xff]  ;;  %s2221_s4 = smov 97   ;;  %s2222_s5 = smov 99   ;;  %vm421_vm12 = vcmask 588800   ;;  %vm423_vm13 = vcmask 736256  }
   0xf   : > { %339 = vrot.lane.b32.xlu1 %v2299_v0, %s2208_s18  ;;  %333 = vrot.lane.b32.xlu0 %v2299_v0, %s2209_s19  ;;  %s2223_s6 = smov 79   ;;  %s2224_s7 = smov 81   ;;  %vm425_vm14 = vcmask 883712   ;;  %vm427_vm15 = vcmask 1031168  }
  0x10   : > { %s2225_s8 = smov 83   ;;  %s2226_s9 = smov 63  }
  0x11   : > { %s2227_s10 = smov 65   ;;  %s2228_s11 = smov 47  }
  0x12   : > { %s2229_s14 = smov 49   ;;  %s2230_s15 = smov 67  }
  0x13   : > { %336 = vrot.lane.b32.xlu0 %v2299_v0, %s2210_s20  ;;  %244 = vrot.lane.b32.xlu1 %v2303_v1, %s2209_s19  ;;  %s2231_s16 = smov 51   ;;  %s2232_s17 = smov 18  }
  0x14   : > { %s2234_s19 = smov 16  }
  0x17   : > { %247 = vrot.lane.b32.xlu0 %v2303_v1, %s2210_s20  ;;  %255 = vrot.lane.b32.xlu1 %v2303_v1, %s2211_s21  ;;  %s2235_s20 = smov 34  }
  0x1b   : > { %258 = vrot.lane.b32.xlu0 %v2303_v1, %s2212_s22  ;;  %189 = vrot.lane.b32.xlu1 %v2303_v1, %s2213_s23 }
  0x1f   : > { %192 = vrot.lane.b32.xlu0 %v2303_v1, %s2214_s24  ;;  %250 = vrot.lane.b32.xlu1 %v2303_v1, %s2208_s18  ;;  %s2233_s18 = smov 126  }
  0x23   : > { %261 = vrot.lane.b32.xlu0 %v2303_v1, %s2215_s25  ;;  %267 = vrot.lane.b32.xlu1 %v2299_v0, %s2213_s23 }
  0x27   : > { %270 = vrot.lane.b32.xlu0 %v2299_v0, %s2214_s24  ;;  %176 = vrot.lane.b32.xlu1 %v2303_v1, %s2216_s26  ;;  %s2238_s24 = smov 54  }
  0x2b   : > { %179 = vrot.lane.b32.xlu0 %v2303_v1, %s2217_s27  ;;  %195 = vrot.lane.b32.xlu1 %v2303_v1, %s2218_s28 }
  0x2f   : > { %273 = vrot.lane.b32.xlu0 %v2299_v0, %s2218_s28  ;;  %278 = vrot.lane.b32.xlu1 %v2299_v0, %s2216_s26  ;;  %s2240_s26 = smov 72   ;;  %s2242_s28 = smov 90  }
  0x33   : > { %281 = vrot.lane.b32.xlu0 %v2299_v0, %s2217_s27  ;;  %182 = vrot.lane.b32.xlu1 %v2303_v1, %s2219_s29  ;;  %s2241_s27 = smov 88  }
  0x37   : > { %200 = vrot.lane.b32.xlu0 %v2303_v1, %s2220_s30  ;;  %203 = vrot.lane.b32.xlu1 %v2303_v1, %s2221_s4 }
  0x3b   : > { %284 = vrot.lane.b32.xlu0 %v2299_v0, %s2219_s29  ;;  %289 = vrot.lane.b32.xlu1 %v2299_v0, %s2220_s30  ;;  %s2243_s29 = smov 106   ;;  %s2244_s30 = smov 124  }
  0x3f   : > { %292 = vrot.lane.b32.xlu0 %v2299_v0, %s2221_s4  ;;  %206 = vrot.lane.b32.xlu1 %v2303_v1, %s2222_s5  ;;  %s2245_s4 = smov 14  }
  0x43   : > { %211 = vrot.lane.b32.xlu0 %v2303_v1, %s2223_s6  ;;  %214 = vrot.lane.b32.xlu1 %v2303_v1, %s2224_s7 }
  0x47   : > { %295 = vrot.lane.b32.xlu0 %v2299_v0, %s2222_s5  ;;  %300 = vrot.lane.b32.xlu1 %v2299_v0, %s2223_s6  ;;  %s2246_s5 = smov 108   ;;  %s2247_s6 = smov 32  }
  0x4b   : > { %303 = vrot.lane.b32.xlu0 %v2299_v0, %s2224_s7  ;;  %344 = vrot.lane.b32.xlu1 %v2299_v0, %s2211_s21  ;;  %s2236_s21 = smov 36   ;;  %s2249_s7 = smov 110  }
  0x4f   : > { %347 = vrot.lane.b32.xlu0 %v2299_v0, %s2212_s22  ;;  %217 = vrot.lane.b32.xlu1 %v2303_v1, %s2225_s8  ;;  %s2237_s22 = smov 52  }
  0x53   : > { %222 = vrot.lane.b32.xlu0 %v2303_v1, %s2226_s9  ;;  %225 = vrot.lane.b32.xlu1 %v2303_v1, %s2227_s10 }
  0x57   : > { %306 = vrot.lane.b32.xlu0 %v2299_v0, %s2225_s8  ;;  %311 = vrot.lane.b32.xlu1 %v2299_v0, %s2226_s9  ;;  %s2251_s8 = smov 109   ;;  %s2252_s9 = smov 91  }
  0x5b   : > { %314 = vrot.lane.b32.xlu0 %v2299_v0, %s2227_s10  ;;  %322 = vrot.lane.b32.xlu1 %v2299_v0, %s2228_s11  ;;  %s2253_s10 = smov 92  }
  0x5f   : > { %325 = vrot.lane.b32.xlu0 %v2299_v0, %s2229_s14  ;;  %350 = vrot.lane.b32.xlu1 %v2299_v0, %s2215_s25  ;;  %s2239_s25 = smov 70  }
  0x63   : > { %228 = vrot.lane.b32.xlu0 %v2303_v1, %s2230_s15  ;;  %233 = vrot.lane.b32.xlu1 %v2303_v1, %s2228_s11  ;;  %s2256_s11 = smov 122  }
  0x67   : > { %236 = vrot.lane.b32.xlu0 %v2303_v1, %s2229_s14  ;;  %317 = vrot.lane.b32.xlu1 %v2299_v0, %s2230_s15  ;;  %s2257_s14 = smov 114   ;;  %s2258_s15 = smov 120  }
  0x6b   : > { %328 = vrot.lane.b32.xlu0 %v2299_v0, %s2231_s16 }
  0x6f   : > { %239 = vrot.lane.b32.xlu0 %v2303_v1, %s2231_s16  ;;  %s2069_s16 = sshll.u32 %s2569_s13, 5  ;;  %s2261_s13 = smov 112  }
  0x81   : > { %v340_v2 = vpop.permute.xlu1 %339  ;;  %v334_v3 = vpop.permute.xlu0 %333 }
  0x85   : > { %v337_v4 = vpop.permute.xlu0 %336  ;;  %v245_v5 = vpop.permute.xlu1 %244 }
  0x86   : > { %v342_v6 = vsel %vm185_vm0, %v334_v3, %v337_v4 }
  0x87   : > { %v2361_v7 = vsel %vm187_vm1, %v342_v6, %v340_v2 }
  0x88   : > { %445 = vrot.lane.b32.xlu1 %v2361_v7, %s2232_s17 }
  0x89   : > { %v248_v8 = vpop.permute.xlu0 %247  ;;  %v256_v9 = vpop.permute.xlu1 %255 }
  0x8a   : > { %v253_v12 = vsel %vm185_vm0, %v245_v5, %v248_v8 }
  0x8d   : > { %v259_v10 = vpop.permute.xlu0 %258  ;;  %v190_v11 = vpop.permute.xlu1 %189 }
  0x8e   : > { %v264_v16 = vsel %vm185_vm0, %v256_v9, %v259_v10 }
  0x91   : > { %v193_v13 = vpop.permute.xlu0 %192  ;;  %v251_v14 = vpop.permute.xlu1 %250 }
  0x92   : > { %v254_v15 = vsel %vm187_vm1, %v253_v12, %v251_v14  ;;  %v198_v22 = vsel %vm185_vm0, %v190_v11, %v193_v13 }
  0x93   : > { %380 = vrot.lane.b32.xlu1 %v254_v15, %s2233_s18 }
  0x95   : > { %v262_v17 = vpop.permute.xlu0 %261  ;;  %v268_v18 = vpop.permute.xlu1 %267 }
  0x96   : > { %v265_v19 = vsel %vm187_vm1, %v264_v16, %v262_v17 }
  0x97   : > { %384 = vrot.lane.b32.xlu0 %v265_v19, %s2234_s19 }
  0x99   : > { %v271_v20 = vpop.permute.xlu0 %270  ;;  %v177_v21 = vpop.permute.xlu1 %176 }
  0x9a   : > { %v276_v26 = vsel %vm185_vm0, %v268_v18, %v271_v20 }
  0x9d   : > { %v180_v23 = vpop.permute.xlu0 %179  ;;  %v196_v24 = vpop.permute.xlu1 %195 }
  0x9e   : > { %v199_v25 = vsel %vm187_vm1, %v198_v22, %v196_v24  ;;  %v186_v30 = vsel %vm185_vm0, %v177_v21, %v180_v23 }
  0x9f   : > { %356 = vrot.lane.b32.xlu1 %v199_v25, %s2232_s17  ;;  %s2259_s17 = smov 118  }
  0xa1   : > { %v274_v27 = vpop.permute.xlu0 %273  ;;  %v279_v28 = vpop.permute.xlu1 %278 }
  0xa2   : > { %v277_v29 = vsel %vm187_vm1, %v276_v26, %v274_v27 }
  0xa3   : > { %388 = vrot.lane.b32.xlu0 %v277_v29, %s2235_s20 }
  0xa5   : > { %v282_v31 = vpop.permute.xlu0 %281  ;;  %v183_v32 = vpop.permute.xlu1 %182 }
  0xa6   : > { %v2375_v33 = vsel %vm187_vm1, %v186_v30, %v183_v32  ;;  %v287_v36 = vsel %vm185_vm0, %v279_v28, %v282_v31 }
  0xa7   : > { %360 = vrot.lane.b32.xlu1 %v2375_v33, %s2236_s21  ;;  %s2264_s21 = smov 98  }
  0xa9   : > { %v201_v34 = vpop.permute.xlu0 %200  ;;  %v204_v35 = vpop.permute.xlu1 %203 }
  0xaa   : > { %v209_v40 = vsel %vm185_vm0, %v201_v34, %v204_v35 }
  0xad   : > { %v285_v37 = vpop.permute.xlu0 %284  ;;  %v290_v38 = vpop.permute.xlu1 %289 }
  0xae   : > { %v288_v39 = vsel %vm187_vm1, %v287_v36, %v285_v37 }
  0xaf   : > { %392 = vrot.lane.b32.xlu0 %v288_v39, %s2237_s22 }
  0xb1   : > { %v293_v41 = vpop.permute.xlu0 %292  ;;  %v207_v42 = vpop.permute.xlu1 %206 }
  0xb2   : > { %v210_v43 = vsel %vm187_vm1, %v209_v40, %v207_v42  ;;  %v298_v46 = vsel %vm185_vm0, %v290_v38, %v293_v41 }
  0xb3   : > { %364 = vrot.lane.b32.xlu1 %v210_v43, %s2238_s24 }
  0xb5   : > { %v212_v44 = vpop.permute.xlu0 %211  ;;  %v215_v45 = vpop.permute.xlu1 %214 }
  0xb6   : > { %v220_v52 = vsel %vm185_vm0, %v212_v44, %v215_v45 }
  0xb9   : > { %v296_v47 = vpop.permute.xlu0 %295  ;;  %v301_v48 = vpop.permute.xlu1 %300 }
  0xba   : > { %v299_v49 = vsel %vm187_vm1, %v298_v46, %v296_v47 }
  0xbb   : > { %396 = vrot.lane.b32.xlu0 %v299_v49, %s2239_s25 }
  0xbd   : > { %v304_v50 = vpop.permute.xlu0 %303  ;;  %v345_v51 = vpop.permute.xlu1 %344 }
  0xbe   : > { %v309_v58 = vsel %vm185_vm0, %v301_v48, %v304_v50 }
  0xc1   : > { %v348_v53 = vpop.permute.xlu0 %347  ;;  %v218_v54 = vpop.permute.xlu1 %217 }
  0xc2   : > { %v221_v55 = vsel %vm187_vm1, %v220_v52, %v218_v54  ;;  %v353_v19 = vsel %vm185_vm0, %v345_v51, %v348_v53  ;;  %v2248_v51 = vmov 0.0  }
  0xc3   : > { %368 = vrot.lane.b32.xlu1 %v221_v55, %s2240_s26  ;;  %2088 = vmatprep.subr.mxu1 %v2248_v51 }
  0xc4   : > { %542 = vmatprep.mubr.f32.mxu0 %v2248_v51 }
  0xc5   : > { %v223_v56 = vpop.permute.xlu0 %222  ;;  %v226_v57 = vpop.permute.xlu1 %225 }
  0xc6   : > { %v231_v4 = vsel %vm185_vm0, %v223_v56, %v226_v57  ;;  %v1887_v56 = vld [vmem:[%s2566_s2] sm:$0x3]  ;;  %v2254_v57 = vmov 0  }
  0xc7   : > { %2198 = vset.pattern.permute.xlu1 %v2254_v57  ;;  %2199 = vset.pattern.permute.xlu0 %v2254_v57 }
  0xc9   : > { %v307_v59 = vpop.permute.xlu0 %306  ;;  %v312_v60 = vpop.permute.xlu1 %311 }
  0xca   : > { %v310_v61 = vsel %vm187_vm1, %v309_v58, %v307_v59 }
  0xcb   : > { %400 = vrot.lane.b32.xlu0 %v310_v61, %s2241_s27 }
  0xcd   : > { %v315_v62 = vpop.permute.xlu0 %314  ;;  %v323_v63 = vpop.permute.xlu1 %322 }
  0xce   : > { %v320_v9 = vsel %vm185_vm0, %v312_v60, %v315_v62 }
  0xd1   : > { %v326_v2 = vpop.permute.xlu0 %325  ;;  %v351_v3 = vpop.permute.xlu1 %350 }
  0xd2   : > { %v331_v13 = vsel %vm185_vm0, %v323_v63, %v326_v2  ;;  %v354_v20 = vsel %vm187_vm1, %v353_v19, %v351_v3  ;;  %v2040_v3 = vld [vmem:[%s2565_s1 + $0x2] sm:$0x3] }
  0xd5   : > { %v229_v5 = vpop.permute.xlu0 %228  ;;  %v234_v6 = vpop.permute.xlu1 %233 }
  0xd6   : > { %v232_v8 = vsel %vm187_vm1, %v231_v4, %v229_v5 }
  0xd7   : > { %372 = vrot.lane.b32.xlu1 %v232_v8, %s2242_s28 }
  0xd9   : > { %v237_v10 = vpop.permute.xlu0 %236  ;;  %v318_v11 = vpop.permute.xlu1 %317 }
  0xda   : > { %v321_v12 = vsel %vm187_vm1, %v320_v9, %v318_v11  ;;  %v242_v16 = vsel %vm185_vm0, %v234_v6, %v237_v10  ;;  %vm2250_vm0 = vmmov 0   ;;  %v456_v11 = vld [vmem:[%s2565_s1] sm:$0x3] }
  0xdb   : > { %404 = vrot.lane.b32.xlu0 %v321_v12, %s2243_s29  ;;  %2090 = vmatprep.mubr.msk.f32.mxu1 %vm2250_vm0, %v2248_v51 }
  0xdd   : > { %v329_v14 = vpop.permute.xlu0 %328 }
  0xde   : > { %v332_v15 = vsel %vm187_vm1, %v331_v13, %v329_v14 }
  0xdf   : > { %408 = vrot.lane.b32.xlu1 %v332_v15, %s2244_s30  ;;  %412 = vrot.lane.b32.xlu0 %v2361_v7, %s2245_s4  ;;  %v2045_v15 = vld [vmem:[%s2565_s1 + $0x4] sm:$0x3] }
  0xe1   : > { %v240_v17 = vpop.permute.xlu0 %239 }
  0xe2   : > { %v243_v18 = vsel %vm187_vm1, %v242_v16, %v240_v17  ;;  %vm443_vm1 = vcmask 113664  }
  0xe3   : > { %376 = vrot.lane.b32.xlu1 %v243_v18, %s2246_s5  ;;  %v2048_v18 = vld [vmem:[%s2565_s1 + $0x6] sm:$0x3] }
  0xfa   : > { %v446_v21 = vpop.permute.xlu1 %445 }
  0xfb   : > { %v448_v22 = vsel %vm415_vm2, %v354_v20, %v446_v21 }
  0xfc   : > { %v449_v23 = vsel %vm417_vm3, %v448_v22, 0.0 }
  0xfd   : > { %451 = vrot.lane.b32.xlu0 %v449_v23, %s2247_s6 }
 0x105   : > { %v381_v24 = vpop.permute.xlu1 %380 }
 0x109   : > { %v385_v28 = vpop.permute.xlu0 %384 }
 0x10a   : > { %v430_v36 = vsel %vm429_vm4, %v381_v24, %v385_v28 }
 0x111   : > { %v357_v25 = vpop.permute.xlu1 %356 }
 0x112   : > { %v416_v7 = vsel %vm415_vm2, %v2375_v33, %v357_v25  ;;  %vm454_vm2 = vcmask 261120  }
 0x115   : > { %v389_v29 = vpop.permute.xlu0 %388 }
 0x116   : > { %v432_v37 = vsel %vm431_vm5, %v430_v36, %v389_v29  ;;  %vm474_vm5 = vcmask 64512  }
 0x119   : > { %v361_v26 = vpop.permute.xlu1 %360 }
 0x11a   : > { %v418_v27 = vsel %vm417_vm3, %v416_v7, %v361_v26  ;;  %vm468_vm3 = vcmask 1039360  }
 0x121   : > { %v393_v30 = vpop.permute.xlu0 %392 }
 0x122   : > { %v434_v39 = vsel %vm433_vm6, %v432_v37, %v393_v30  ;;  %vm931_vm6 = vcmask 900096   ;;  %v2060_v37 = vld [vmem:[%s2565_s1 + $0xe] sm:$0x3] }
 0x125   : > { %v365_v31 = vpop.permute.xlu1 %364 }
 0x126   : > { %v420_v45 = vsel %vm419_vm11, %v418_v27, %v365_v31  ;;  %v2054_v27 = vld [vmem:[%s2565_s1 + $0xa] sm:$0x3]  ;;  %vm1949_vm11 = vcmask 818176  }
 0x12d   : > { %v397_v32 = vpop.permute.xlu0 %396 }
 0x12e   : > { %v436_v40 = vsel %vm435_vm7, %v434_v39, %v397_v32  ;;  %vm1092_vm7 = vcmask 891904   ;;  %v2057_v32 = vld [vmem:[%s2565_s1 + $0xc] sm:$0x3] }
 0x135   : > { %v369_v34 = vpop.permute.xlu1 %368 }
 0x136   : > { %v422_v46 = vsel %vm421_vm12, %v420_v45, %v369_v34  ;;  %vm1959_vm12 = vcmask 523264  }
 0x13d   : > { %v401_v35 = vpop.permute.xlu0 %400 }
 0x13e   : > { %v438_v41 = vsel %vm437_vm8, %v436_v40, %v401_v35  ;;  %vm1413_vm8 = vcmask 752640  }
 0x149   : > { %v373_v38 = vpop.permute.xlu1 %372 }
 0x14a   : > { %v424_v47 = vsel %vm423_vm13, %v422_v46, %v373_v38 }
 0x14d   : > { %v405_v33 = vpop.permute.xlu0 %404 }
 0x14e   : > { %v440_v42 = vsel %vm439_vm9, %v438_v41, %v405_v33  ;;  %vm1574_vm9 = vcmask 744448   ;;  %v2063_v41 = vld [vmem:[%s2565_s1 + $0x10] sm:$0x3] }
 0x151   : > { %v409_v43 = vpop.permute.xlu1 %408  ;;  %v413_v52 = vpop.permute.xlu0 %412 }
 0x152   : > { %v2405_v44 = vsel %vm441_vm10, %v440_v42, %v409_v43  ;;  %v444_v53 = vsel %vm443_vm1, %v409_v43, %v413_v52  ;;  %vm1957_vm10 = vcmask 392192  }
 0x153   : > { %767 = vrot.lane.b32.xlu0 %v2405_v44, %s2233_s18  ;;  %464 = vrot.lane.b32.xlu1 %v2405_v44, %s2213_s23 }
 0x155   : > { %v377_v48 = vpop.permute.xlu1 %376 }
 0x156   : > { %v426_v49 = vsel %vm425_vm14, %v424_v47, %v377_v48 }
 0x157   : > { %v2414_v50 = vsel %vm427_vm15, %v426_v49, %v381_v24  ;;  %v2051_v24 = vld [vmem:[%s2565_s1 + $0x8] sm:$0x3] }
 0x158   : > { %765 = vrot.lane.b32.xlu0 %v2414_v50, %s2233_s18  ;;  %462 = vrot.lane.b32.xlu1 %v2414_v50, %s2213_s23 }
 0x15c   : > { %927 = vrot.lane.b32.xlu1 %v2405_v44, %s2249_s7 }
 0x160   : > { %925 = vrot.lane.b32.xlu1 %v2414_v50, %s2249_s7 }
 0x164   : > { %1249 = vrot.lane.b32.xlu1 %v2405_v44, %s2246_s5 }
 0x16f   : > { %v452_v54 = vpop.permute.xlu0 %451 }
 0x170   : > { %v455_v55 = vsel %vm454_vm2, %v444_v53, %v452_v54 }
 0x171   : > { %466 = vrot.lane.b32.xlu0 %v455_v55, %s2213_s23  ;;  %769 = vrot.lane.b32.xlu1 %v455_v55, %s2233_s18  ;;  %s2255_s23 = smov 100  }
 0x175   : > { %1088 = vrot.lane.b32.xlu0 %v2405_v44, %s2251_s8  ;;  %1247 = vrot.lane.b32.xlu1 %v2414_v50, %s2246_s5 }
 0x179   : > { %1086 = vrot.lane.b32.xlu0 %v2414_v50, %s2251_s8  ;;  %1090 = vrot.lane.b32.xlu1 %v455_v55, %s2251_s8 }
 0x17d   : > { %929 = vrot.lane.b32.xlu0 %v455_v55, %s2249_s7  ;;  %1570 = vrot.lane.b32.xlu1 %v2405_v44, %s2252_s9 }
 0x181   : > { %1409 = vrot.lane.b32.xlu0 %v2405_v44, %s2253_s10  ;;  %1411 = vrot.lane.b32.xlu1 %v455_v55, %s2253_s10 }
 0x185   : > { %1251 = vrot.lane.b32.xlu0 %v455_v55, %s2246_s5  ;;  %1568 = vrot.lane.b32.xlu1 %v2414_v50, %s2252_s9 }
 0x189   : > { %1407 = vrot.lane.b32.xlu0 %v2414_v50, %s2253_s10  ;;  %1733 = vrot.lane.b32.xlu1 %v455_v55, %s2242_s28 }
 0x18d   : > { %1572 = vrot.lane.b32.xlu0 %v455_v55, %s2252_s9  ;;  %1890 = vperm.xlu1 %2198, %v1887_v56  }
 0x191   : > { %1731 = vrot.lane.b32.xlu0 %v2405_v44, %s2242_s28 }
 0x195   : > { %1729 = vrot.lane.b32.xlu0 %v2414_v50, %s2242_s28 }
 0x1c5   : > { %v465_v58 = vpop.permute.xlu1 %464  ;;  %v768_v61 = vpop.permute.xlu0 %767 }
 0x1ca   : > { %v463_v59 = vpop.permute.xlu1 %462  ;;  %v766_v63 = vpop.permute.xlu0 %765 }
 0x1cb   : > { %v469_v8 = vsel %vm468_vm3, %v463_v59, %v465_v58  ;;  %v771_v16 = vsel %vm427_vm15, %v766_v63, %v768_v61 }
 0x1ce   : > { %v928_v60 = vpop.permute.xlu1 %927 }
 0x1d2   : > { %v926_v62 = vpop.permute.xlu1 %925 }
 0x1d3   : > { %v932_v21 = vsel %vm931_vm6, %v926_v62, %v928_v60 }
 0x1d6   : > { %v2451_v2 = vpop.permute.xlu1 %1249 }
 0x1e3   : > { %v467_v4 = vpop.permute.xlu0 %466  ;;  %v770_v5 = vpop.permute.xlu1 %769 }
 0x1e4   : > { %2089 = vmatpush3.msra.mxu1 %v467_v4  ;;  %v470_v6 = vsel %vm468_vm3, %v465_v58, %v467_v4  ;;  %v772_v12 = vsel %vm427_vm15, %v768_v61, %v770_v5  ;;  %vm1923_vm15 = vcmask 932864  }
 0x1e5   : > { %508 = vmatprep.subr.mxu0 %v470_v6  ;;  %2091 = vmatmul.mubr.msk.f32.vlgmr.msra.gmra.mxu1 %vm474_vm5, %v2040_v3 }
 0x1e6   : > { %2093 = vmatprep.subr.mxu1 %v2248_v51  ;;  %509 = vmatpush1.msra.mxu0 %v469_v8 }
 0x1e7   : > { %2094 = vmatpush3.msra.mxu1 %v455_v55  ;;  %v1089_v9 = vpop.permute.xlu0 %1088  ;;  %2041 = vmatmul.mubr.msk.f32.vlgmr.msra.gmra.mxu0 %vm474_vm5, %v2040_v3  ;;  %v1248_v10 = vpop.permute.xlu1 %1247 }
 0x1e8   : > { %652 = vmatprep.subr.mxu0 %v2405_v44  ;;  %2095 = vmatprep.mubr.msk.f32.mxu1 %vm2250_vm0, %v2248_v51  ;;  %v1253_v29 = vsel %vm425_vm14, %v1248_v10, %v2451_v2 }
 0x1e9   : > { %653 = vmatpush1.msra.mxu0 %v2414_v50  ;;  %2098 = vmatprep.subr.mxu1 %v2248_v51 }
 0x1ea   : > { %2096 = vmatmul.mubr.msk.f32.vlgmr.msra.gmra.mxu1 %vm474_vm5, %v456_v11  ;;  %809 = vmatprep.subr.mxu0 %v772_v12 }
 0x1eb   : > { %2099 = vmatpush3.msra.mxu1 %v770_v5  ;;  %686 = vmatprep.mubr.f32.mxu0 %v2248_v51  ;;  %v1087_v13 = vpop.permute.xlu0 %1086  ;;  %v1091_v14 = vpop.permute.xlu1 %1090 }
 0x1ec   : > { %2043 = vmatmul.mubr.msk.f32.vlgmr.msra.gmra.mxu0 %vm474_vm5, %v456_v11  ;;  %2100 = vmatprep.mubr.msk.f32.mxu1 %vm2250_vm0, %v2248_v51  ;;  %v1094_v23 = vsel %vm1092_vm7, %v1089_v9, %v1091_v14  ;;  %v1093_v25 = vsel %vm1092_vm7, %v1087_v13, %v1089_v9 }
 0x1ed   : > { %810 = vmatpush1.msra.mxu0 %v771_v16  ;;  %843 = vmatprep.mubr.f32.mxu0 %v2248_v51 }
 0x1ee   : > { %2101 = vmatmul.mubr.msk.f32.vlgmr.msra.gmra.mxu1 %vm474_vm5, %v2045_v15  ;;  %2103 = vmatprep.subr.mxu1 %v2248_v51 }
 0x1ef   : > { %v930_v17 = vpop.permute.xlu0 %929  ;;  %2105 = vmatprep.mubr.msk.f32.mxu1 %vm2250_vm0, %v2248_v51  ;;  %v1571_v19 = vpop.permute.xlu1 %1570 }
 0x1f0   : > { %2046 = vmatmul.mubr.msk.f32.vlgmr.msra.gmra.mxu0 %vm474_vm5, %v2045_v15  ;;  %2104 = vmatpush3.msra.mxu1 %v930_v17  ;;  %v933_v20 = vsel %vm931_vm6, %v928_v60, %v930_v17 }
 0x1f1   : > { %970 = vmatprep.subr.mxu0 %v933_v20  ;;  %2108 = vmatprep.subr.mxu1 %v2248_v51 }
 0x1f2   : > { %2106 = vmatmul.mubr.msk.f32.vlgmr.msra.gmra.mxu1 %vm474_vm5, %v2048_v18  ;;  %971 = vmatpush1.msra.mxu0 %v932_v21 }
 0x1f3   : > { %1004 = vmatprep.mubr.f32.mxu0 %v2248_v51  ;;  %2109 = vmatpush3.msra.mxu1 %v1091_v14  ;;  %v1410_v22 = vpop.permute.xlu0 %1409  ;;  %v1412_v7 = vpop.permute.xlu1 %1411 }
 0x1f4   : > { %2049 = vmatmul.mubr.msk.f32.vlgmr.msra.gmra.mxu0 %vm474_vm5, %v2048_v18  ;;  %1131 = vmatprep.subr.mxu0 %v1094_v23  ;;  %v1415_v31 = vsel %vm1413_vm8, %v1410_v22, %v1412_v7 }
 0x1f5   : > { %1132 = vmatpush1.msra.mxu0 %v1093_v25  ;;  %2110 = vmatprep.mubr.msk.f32.mxu1 %vm2250_vm0, %v2248_v51 }
 0x1f6   : > { %2111 = vmatmul.mubr.msk.f32.vlgmr.msra.gmra.mxu1 %vm474_vm5, %v2051_v24  ;;  %1165 = vmatprep.mubr.f32.mxu0 %v2248_v51 }
 0x1f7   : > { %v1252_v26 = vpop.permute.xlu0 %1251  ;;  %2113 = vmatprep.subr.mxu1 %v2248_v51  ;;  %2115 = vmatprep.mubr.msk.f32.mxu1 %vm2250_vm0, %v2248_v51  ;;  %v1569_v34 = vpop.permute.xlu1 %1568 }
 0x1f8   : > { %2052 = vmatmul.mubr.msk.f32.vlgmr.msra.gmra.mxu0 %vm474_vm5, %v2051_v24  ;;  %2114 = vmatpush3.msra.mxu1 %v1252_v26  ;;  %v1254_v28 = vsel %vm425_vm14, %v2451_v2, %v1252_v26  ;;  %v1575_v39 = vsel %vm1574_vm9, %v1569_v34, %v1571_v19  ;;  %vm1963_vm14 = vcmask 785408  }
 0x1f9   : > { %1291 = vmatprep.subr.mxu0 %v1254_v28  ;;  %2118 = vmatprep.subr.mxu1 %v2248_v51 }
 0x1fa   : > { %2116 = vmatmul.mubr.msk.f32.vlgmr.msra.gmra.mxu1 %vm474_vm5, %v2054_v27  ;;  %1292 = vmatpush1.msra.mxu0 %v1253_v29 }
 0x1fb   : > { %1325 = vmatprep.mubr.f32.mxu0 %v2248_v51  ;;  %2119 = vmatpush3.msra.mxu1 %v1412_v7  ;;  %v1408_v30 = vpop.permute.xlu0 %1407  ;;  %v1734_v33 = vpop.permute.xlu1 %1733 }
 0x1fc   : > { %v1414_v35 = vsel %vm1413_vm8, %v1408_v30, %v1410_v22  ;;  %2055 = vmatmul.mubr.msk.f32.vlgmr.msra.gmra.mxu0 %vm474_vm5, %v2054_v27  ;;  %1452 = vmatprep.subr.mxu0 %v1415_v31 }
 0x1fd   : > { %2120 = vmatprep.mubr.msk.f32.mxu1 %vm2250_vm0, %v2248_v51  ;;  %1453 = vmatpush1.msra.mxu0 %v1414_v35 }
 0x1fe   : > { %2121 = vmatmul.mubr.msk.f32.vlgmr.msra.gmra.mxu1 %vm474_vm5, %v2057_v32  ;;  %1486 = vmatprep.mubr.f32.mxu0 %v2248_v51 }
 0x1ff   : > { %v1573_v36 = vpop.permute.xlu0 %1572  ;;  %2123 = vmatprep.subr.mxu1 %v2248_v51  ;;  %2125 = vmatprep.mubr.msk.f32.mxu1 %vm2250_vm0, %v2248_v51 }
 0x200   : > { %2058 = vmatmul.mubr.msk.f32.vlgmr.msra.gmra.mxu0 %vm474_vm5, %v2057_v32  ;;  %2124 = vmatpush3.msra.mxu1 %v1573_v36  ;;  %v1576_v38 = vsel %vm1574_vm9, %v1571_v19, %v1573_v36 }
 0x201   : > { %1613 = vmatprep.subr.mxu0 %v1576_v38  ;;  %2128 = vmatprep.subr.mxu1 %v2248_v51 }
 0x202   : > { %2126 = vmatmul.mubr.msk.f32.vlgmr.msra.gmra.mxu1 %vm474_vm5, %v2060_v37  ;;  %1614 = vmatpush1.msra.mxu0 %v1575_v39 }
 0x203   : > { %1647 = vmatprep.mubr.f32.mxu0 %v2248_v51  ;;  %2129 = vmatpush3.msra.mxu1 %v1734_v33  ;;  %v1732_v40 = vpop.permute.xlu0 %1731 }
 0x204   : > { %2061 = vmatmul.mubr.msk.f32.vlgmr.msra.gmra.mxu0 %vm474_vm5, %v2060_v37  ;;  %2130 = vmatprep.mubr.msk.f32.mxu1 %vm2250_vm0, %v2248_v51  ;;  %v1736_v42 = vsel %vm423_vm13, %v1732_v40, %v1734_v33 }
 0x205   : > { %1773 = vmatprep.subr.mxu0 %v1736_v42  ;;  %1807 = vmatprep.mubr.f32.mxu0 %v2248_v51 }
 0x206   : > { %2131 = vmatmul.mubr.msk.f32.vlgmr.msra.gmra.mxu1 %vm474_vm5, %v2063_v41 }
 0x207   : > { %v1730_v43 = vpop.permute.xlu0 %1729 }
 0x208   : > { %v1735_v44 = vsel %vm423_vm13, %v1730_v43, %v1732_v40  ;;  %v1891_v30 = vpop.permute.xlu1 %1890  ;;  %vm1961_vm13 = vcmask 654336  }
 0x209   : > { %1774 = vmatpush1.msra.mxu0 %v1735_v44 }
 0x20a   : > { %2064 = vmatmul.mubr.msk.f32.vlgmr.msra.gmra.mxu0 %vm474_vm5, %v2063_v41 }
 0x2a5   : > { %v615_v45 = vpop.f32.mrf.mxu1 }
 0x2a7   : > { %v544_v46 = vpop.f32.mrf.mxu0  ;;  %v2092_v47 = vpop.f32.mrf.mxu1 }
 0x2a9   : > { %v546_v48 = vpop.f32.mrf.mxu0 }
 0x2aa   : > { %v759_v49 = vpop.f32.mrf.mxu1 }
 0x2ab   : > { %v760_v2 = vadd.f32 %v759_v49, %v615_v45 }
 0x2ac   : > { %v688_v50 = vpop.f32.mrf.mxu0  ;;  %v2097_v52 = vpop.f32.mrf.mxu1 }
 0x2ad   : > { %v689_v9 = vadd.f32 %v688_v50, %v544_v46 }
 0x2ae   : > { %v690_v53 = vpop.f32.mrf.mxu0  ;;  %v916_v54 = vpop.f32.mrf.mxu1 }
 0x2af   : > { %v922_v5 = vadd.f32 %v916_v54, %v760_v2  ;;  %v691_v17 = vadd.f32 %v690_v53, %v546_v48 }
 0x2b0   : > { %v845_v55 = vpop.f32.mrf.mxu0  ;;  %v2102_v56 = vpop.f32.mrf.mxu1 }
 0x2b1   : > { %v920_v13 = vadd.f32 %v845_v55, %v689_v9 }
 0x2b2   : > { %v847_v51 = vpop.f32.mrf.mxu0  ;;  %v1077_v57 = vpop.f32.mrf.mxu1 }
 0x2b3   : > { %v1083_v10 = vadd.f32 %v1077_v57, %v922_v5  ;;  %v921_v22 = vadd.f32 %v847_v51, %v691_v17 }
 0x2b4   : > { %v1006_v58 = vpop.f32.mrf.mxu0  ;;  %v2107_v59 = vpop.f32.mrf.mxu1 }
 0x2b5   : > { %v1081_v18 = vadd.f32 %v1006_v58, %v920_v13 }
 0x2b6   : > { %v1008_v60 = vpop.f32.mrf.mxu0  ;;  %v1238_v61 = vpop.f32.mrf.mxu1 }
 0x2b7   : > { %v1244_v14 = vadd.f32 %v1238_v61, %v1083_v10  ;;  %v1082_v26 = vadd.f32 %v1008_v60, %v921_v22 }
 0x2b8   : > { %v1167_v62 = vpop.f32.mrf.mxu0  ;;  %v2112_v63 = vpop.f32.mrf.mxu1 }
 0x2b9   : > { %v1242_v23 = vadd.f32 %v1167_v62, %v1081_v18 }
 0x2ba   : > { %v1169_v3 = vpop.f32.mrf.mxu0  ;;  %v1398_v4 = vpop.f32.mrf.mxu1 }
 0x2bb   : > { %v1404_v19 = vadd.f32 %v1398_v4, %v1244_v14  ;;  %v1243_v31 = vadd.f32 %v1169_v3, %v1082_v26 }
 0x2bc   : > { %v1327_v6 = vpop.f32.mrf.mxu0  ;;  %v2117_v8 = vpop.f32.mrf.mxu1 }
 0x2bd   : > { %v1402_v27 = vadd.f32 %v1327_v6, %v1242_v23 }
 0x2be   : > { %v1329_v11 = vpop.f32.mrf.mxu0  ;;  %v1559_v12 = vpop.f32.mrf.mxu1 }
 0x2bf   : > { %v1565_v24 = vadd.f32 %v1559_v12, %v1404_v19  ;;  %v1403_v37 = vadd.f32 %v1329_v11, %v1243_v31 }
 0x2c0   : > { %v1488_v15 = vpop.f32.mrf.mxu0  ;;  %v2122_v16 = vpop.f32.mrf.mxu1 }
 0x2c1   : > { %v1563_v32 = vadd.f32 %v1488_v15, %v1402_v27 }
 0x2c2   : > { %v1490_v20 = vpop.f32.mrf.mxu0  ;;  %v1720_v21 = vpop.f32.mrf.mxu1 }
 0x2c3   : > { %v1726_v28 = vadd.f32 %v1720_v21, %v1565_v24  ;;  %v1564_v40 = vadd.f32 %v1490_v20, %v1403_v37 }
 0x2c4   : > { %v1649_v25 = vpop.f32.mrf.mxu0  ;;  %v2127_v7 = vpop.f32.mrf.mxu1 }
 0x2c5   : > { %v1724_v38 = vadd.f32 %v1649_v25, %v1563_v32 }
 0x2c6   : > { %v1880_v29 = vpop.f32.mrf.mxu1  ;;  %v1651_v35 = vpop.f32.mrf.mxu0 }
 0x2c7   : > { %v1886_v34 = vadd.f32 %v1880_v29, %v1726_v28  ;;  %v1725_v44 = vadd.f32 %v1651_v35, %v1564_v40 }
 0x2c8   : > { %v2132_v36 = vpop.f32.mrf.mxu1 }
 0x2c9   : > { %v1895_v39 = vadd.f32 %v1891_v30, %v1886_v34 }
 0x2ca   : > { %v1809_v33 = vpop.f32.mrf.mxu0 }
 0x2cb   : > { %v1884_v41 = vadd.f32 %v1809_v33, %v1724_v38  ;;  %v1898_v42 = vmax.f32 %v1895_v39, 0.0 }
 0x2cc   : > { %v1811_v43 = vpop.f32.mrf.mxu0 }
 0x2cd   : > { %v1893_v45 = vadd.f32 %v1891_v30, %v1884_v41  ;;  %1947 = vrot.lane.b32.xlu0 %v1898_v42, %s2255_s23  ;;  %v1885_v47 = vadd.f32 %v1811_v43, %v1725_v44 }
 0x2cf   : > { %v1896_v46 = vmax.f32 %v1893_v45, 0.0  ;;  %v1894_v48 = vadd.f32 %v1891_v30, %v1885_v47 }
 0x2d1   : > { %1903 = vrot.lane.b32.xlu1 %v1896_v46, %s2244_s30  ;;  %1900 = vrot.lane.b32.xlu0 %v1896_v46, %s2233_s18  ;;  %v1897_v49 = vmax.f32 %v1894_v48, 0.0  ;;  %s2548_s30 = scalar_lea.vmem %s2567_s3, %s2069_s16  ;;  %s2260_s18 = smov 116  }
 0x2d2   : > { %174 = vst [vmem:[%s2548_s30 + $0x8] sm:$0xff] %v2299_v0  ;;  %173 = vst [vmem:[%s2548_s30] sm:$0xff] %v2303_v1 }
 0x2d5   : > { %1906 = vrot.lane.b32.xlu1 %v1896_v46, %s2256_s11  ;;  %1919 = vrot.lane.b32.xlu0 %v1896_v46, %s2257_s14 }
 0x2d9   : > { %1909 = vrot.lane.b32.xlu1 %v1896_v46, %s2258_s15  ;;  %1929 = vrot.lane.b32.xlu0 %v1897_v49, %s2249_s7  ;;  %s2262_s7 = smov 104  }
 0x2dd   : > { %1912 = vrot.lane.b32.xlu1 %v1896_v46, %s2259_s17  ;;  %1932 = vrot.lane.b32.xlu0 %v1897_v49, %s2246_s5  ;;  %s2263_s5 = smov 102  }
 0x2e1   : > { %1915 = vrot.lane.b32.xlu1 %v1896_v46, %s2260_s18  ;;  %1935 = vrot.lane.b32.xlu0 %v1897_v49, %s2243_s29 }
 0x2e5   : > { %1926 = vrot.lane.b32.xlu1 %v1897_v49, %s2261_s13  ;;  %1938 = vrot.lane.b32.xlu0 %v1897_v49, %s2262_s7 }
 0x2e9   : > { %1945 = vrot.lane.b32.xlu1 %v1897_v49, %s2255_s23  ;;  %1941 = vrot.lane.b32.xlu0 %v1897_v49, %s2263_s5 }
 0x2ed   : > { %1921 = vrot.lane.b32.xlu1 %v1897_v49, %s2257_s14  ;;  %1952 = vrot.lane.b32.xlu0 %v1898_v42, %s2264_s21 }
 0x33f   : > { %v1948_v50 = vpop.permute.xlu0 %1947 }
 0x343   : > { %v1904_v52 = vpop.permute.xlu1 %1903  ;;  %v1901_v53 = vpop.permute.xlu0 %1900 }
 0x344   : > { %v1955_v62 = vsel %vm429_vm4, %v1896_v46, %v1901_v53 }
 0x345   : > { %v1956_v6 = vsel %vm454_vm2, %v1955_v62, %v1904_v52 }
 0x347   : > { %v1907_v0 = vpop.permute.xlu1 %1906  ;;  %v1920_v54 = vpop.permute.xlu0 %1919 }
 0x348   : > { %v1958_v10 = vsel %vm1957_vm10, %v1956_v6, %v1907_v0 }
 0x34b   : > { %v1910_v1 = vpop.permute.xlu1 %1909  ;;  %v1930_v55 = vpop.permute.xlu0 %1929 }
 0x34c   : > { %v1960_v11 = vsel %vm1959_vm12, %v1958_v10, %v1910_v1 }
 0x34f   : > { %v1913_v56 = vpop.permute.xlu1 %1912  ;;  %v1933_v51 = vpop.permute.xlu0 %1932 }
 0x350   : > { %v1962_v12 = vsel %vm1961_vm13, %v1960_v11, %v1913_v56 }
 0x353   : > { %v1916_v57 = vpop.permute.xlu1 %1915  ;;  %v1936_v58 = vpop.permute.xlu0 %1935 }
 0x354   : > { %v1964_v16 = vsel %vm1963_vm14, %v1962_v12, %v1916_v57 }
 0x357   : > { %v1927_v59 = vpop.permute.xlu1 %1926  ;;  %v1939_v60 = vpop.permute.xlu0 %1938 }
 0x358   : > { %v1967_v61 = vsel %vm429_vm4, %v1927_v59, %v1930_v55  ;;  %vm1965_vm4 = vcmask 916480  }
 0x359   : > { %v1968_v63 = vsel %vm454_vm2, %v1967_v61, %v1933_v51 }
 0x35a   : > { %v1969_v2 = vsel %vm1957_vm10, %v1968_v63, %v1936_v58 }
 0x35b   : > { %v1970_v3 = vsel %vm1959_vm12, %v1969_v2, %v1939_v60  ;;  %v1946_v4 = vpop.permute.xlu1 %1945  ;;  %v1942_v5 = vpop.permute.xlu0 %1941 }
 0x35c   : > { %v1950_v8 = vsel %vm1949_vm11, %v1946_v4, %v1948_v50  ;;  %v1971_v9 = vsel %vm1961_vm13, %v1970_v3, %v1942_v5 }
 0x35d   : > { %v1972_v14 = vsel %vm1963_vm14, %v1971_v9, %v1950_v8 }
 0x35f   : > { %v1922_v13 = vpop.permute.xlu1 %1921  ;;  %v1953_v15 = vpop.permute.xlu0 %1952 }
 0x360   : > { %v1924_v17 = vsel %vm1923_vm15, %v1920_v54, %v1922_v13  ;;  %v1973_v18 = vsel %vm1965_vm4, %v1972_v14, %v1953_v15 }
 0x361   : > { %v1966_v19 = vsel %vm1965_vm4, %v1964_v16, %v1924_v17  ;;  %1975 = vst [vmem:[%s2548_s30 + $0x18] sm:$0x3] %v1973_v18 }
 0x362   : > { %1974 = vst [vmem:[%s2548_s30 + $0x10] sm:$0x3] %v1966_v19 }
 0x363 PF: > { %s13_s12 = sadd.s32 1, %s2206_s12  }
 0x364   : > { %p10_p4 = scmp.ge.s32.totalorder %s13_s12, 4  }
 0x366   :  { %12 = sbr.rel (!%p10_p4) target bundleno = 1 (0x1), region = 70 }

</bundles_post_ra>
